<compile_context>
chip_gen: v5e
topology: v5e:2x2
jax: 0.10.0
libtpu: 0.0.40
codegen_flags: <defaults>
</compile_context>

<pallas_src>
import functools

import jax
import jax.numpy as jnp
from jax.experimental import pallas as pl
from jax.experimental.pallas import tpu as pltpu


# ---------------------------------------------------------------------------
# Hardware introspection helpers
# ---------------------------------------------------------------------------
def _device_kind():
    try:
        return jax.devices()[0].device_kind.lower().replace(" ", "")
    except Exception:
        return ""


def _is_v7x():
    kind = _device_kind()
    return ("v7" in kind) or ("tpu7" in kind)


def _mxu_has_int8_path():
    """v7x MXU is bf16/fp8-only; v5e/v6e (and earlier) have a native int8 path."""
    return not _is_v7x()


def _vmem_limit_bytes():
    """Physical VMEM with ~25% headroom (compiler scratch / semaphores / spill),
    instead of a flat cap: 64 MiB (v7x) -> 48 MiB, 128 MiB (v5e/v6e) -> 96 MiB."""
    try:
        cap = int(pltpu.get_tpu_info().vmem_capacity_bytes)
        return (cap * 3) // 4
    except Exception:
        return (48 if _is_v7x() else 96) * 1024 * 1024


def _round_up(v, m):
    return ((v + m - 1) // m) * m


# ---------------------------------------------------------------------------
# Kernel
# ---------------------------------------------------------------------------
def _qkv_int8_kernel(x_ref, w_ref, colscale_ref, bias_ref, o_ref,
                     xq_ref, rowscale_ref, *, per_token, has_bias, use_bf16):
    """One (tm, tn) output tile of the fused quantize-matmul-dequant-bias."""
    j = pl.program_id(1)

    # Quantize the activation row-tile once per M block.  The x BlockSpec
    # returns the same block index for every j, so both the DMA and this
    # absmax/round work only happen when a new row tile starts.
    # TODO(synk): overlap this quantize with the tail j-iterations of the
    # previous i-block (manual prefetch) to remove the per-i-block bubble.
    @pl.when(j == 0)
    def _quantize():
        x = x_ref[...].astype(jnp.float32)                       # (tm, K)
        if per_token:
            qs = jnp.max(jnp.abs(x), axis=-1, keepdims=True) / 127.0
            # deliberate deviation: torch reference NaNs on all-zero rows
            qs = jnp.maximum(qs, 1e-8)
            inv = 1.0 / qs                                       # tm exact divides
            xq = jnp.clip(jnp.round(x * inv), -128.0, 127.0)     # (tm,K) multiplies
            rowscale_ref[...] = qs                               # (tm, 1)
        else:
            xq = jnp.clip(jnp.round(x), -128.0, 127.0)
        xq_ref[...] = xq.astype(xq_ref.dtype)

    if use_bf16:
        # v7x: no integer MXU datapath.  int8 values are exact in bf16; f32
        # accumulation may round for large K, matching the int32 GEMM to a
        # tiny relative tolerance.
        acc = jax.lax.dot_general(
            xq_ref[...], w_ref[...].astype(jnp.bfloat16),
            dimension_numbers=(((1,), (0,)), ((), ())),
            preferred_element_type=jnp.float32)                  # (tm, tn) f32
    else:
        acc = jax.lax.dot_general(
            xq_ref[...], w_ref[...],
            dimension_numbers=(((1,), (0,)), ((), ())),
            preferred_element_type=jnp.int32).astype(jnp.float32)

    col = colscale_ref[...]                                      # (1, tn)
    if per_token:
        out = (rowscale_ref[...] * col) * acc                    # per-row x per-col
    else:
        out = col * acc                                          # per-col only
    if has_bias:
        out = out + bias_ref[...]
    o_ref[...] = out.astype(o_ref.dtype)


# ---------------------------------------------------------------------------
# One-time (model-load) parameter preparation
# ---------------------------------------------------------------------------
def prepare_qkv_params(weight_i8, qkv_size, q_scale, k_scale, v_scale,
                       bias=None):
    """Pre-transpose the int8 weight to (K, N) and build the fused per-output-
    column dequant scale / bias rows.  Doing this once at load time removes a
    full HBM read+write of the weight from every forward call."""
    N, K = weight_i8.shape
    assert sum(qkv_size) == N
    w_kn = jnp.asarray(weight_i8).T                              # (K, N) int8
    col_scale = jnp.concatenate([
        jnp.full((qkv_size[0],), q_scale, jnp.float32),
        jnp.full((qkv_size[1],), k_scale, jnp.float32),
        jnp.full((qkv_size[2],), v_scale, jnp.float32),
    ]).reshape(1, N)
    has_bias = bias is not None
    bias_vec = (jnp.asarray(bias, jnp.float32) if has_bias
                else jnp.zeros((N,), jnp.float32)).reshape(1, N)
    return w_kn, col_scale, bias_vec, has_bias


# ---------------------------------------------------------------------------
# Tile policy
# ---------------------------------------------------------------------------
def _footprint_bytes(tm, tn, K, x_itemsize, xq_itemsize):
    return (2 * tm * K * x_itemsize        # x, double-buffered
            + 2 * K * tn * 1               # int8 weight, double-buffered
            + 2 * tm * tn * 4              # output, double-buffered
            + tm * K * xq_itemsize         # quantized x scratch
            + tm * 4                       # row-scale scratch
            + 2 * 2 * tn * 4)              # col-scale + bias rows


def _tile_policy(T, K, N, x_itemsize, xq_itemsize, vmem_limit):
    multi_core = _is_v7x()
    # tm >= 512 for prefill so the re-streamed weight crosses the v6e/v7x
    # roofline ridge; small T uses the (8-rounded) full extent.
    tm = min(512, _round_up(T, 8))
    # v7x megacore fix: with a single i-block only one TensorCore works (j is
    # 'arbitrary'); split T across >= 2 i-blocks when possible.
    if multi_core and T > 8 and pl.cdiv(T, tm) < 2:
        tm = _round_up(pl.cdiv(T, 2), 8)
    # tn: 1024 on v5e/v6e (128 MiB VMEM, fewer j steps, lane-dense stores),
    # 512 on v7x (64 MiB VMEM).  Round down to a multiple of 128 (Pallas masks
    # the ragged tail block) instead of falling back to full-extent N.
    tn_target = 512 if multi_core else 1024
    tn = N if N < 128 else min(tn_target, (N // 128) * 128)
    # Keep the double-buffered footprint inside the VMEM budget.
    while _footprint_bytes(tm, tn, K, x_itemsize, xq_itemsize) > vmem_limit and tm > 64:
        tm //= 2
    return tm, tn


# ---------------------------------------------------------------------------
# Forward wrapper (hot path — no weight transpose, no scale/bias rebuild)
# ---------------------------------------------------------------------------
def w8a8_qkv_linear(x, w_kn, col_scale, bias_vec, *, has_bias,
                    act_quant='per-tensor'):
    """JAX/Pallas equivalent of W8A8BFP32OFP32QKVLinear.forward.
    `w_kn`, `col_scale`, `bias_vec` come from prepare_qkv_params (load time)."""
    assert act_quant in ('per-token', 'per-tensor')
    x_shape = x.shape
    out_dtype = x.dtype

    x2 = x.reshape(-1, x_shape[-1])          # keep input dtype; upcast in kernel
    T, K = x2.shape
    Kw, N = w_kn.shape
    assert K == Kw

    use_bf16 = not _mxu_has_int8_path()
    per_token = (act_quant == 'per-token')
    xq_dtype = jnp.bfloat16 if use_bf16 else jnp.int8

    vmem_limit = _vmem_limit_bytes()
    tm, tn = _tile_policy(T, K, N, x2.dtype.itemsize,
                          jnp.dtype(xq_dtype).itemsize, vmem_limit)

    kernel = functools.partial(_qkv_int8_kernel, per_token=per_token,
                               has_bias=has_bias, use_bf16=use_bf16)
    grid = (pl.cdiv(T, tm), pl.cdiv(N, tn))

    cost = pl.CostEstimate(
        flops=2 * T * K * N,
        transcendentals=0,
        bytes_accessed=(T * K * x2.dtype.itemsize          # activations
                        + K * N                            # int8 weight
                        + T * N * jnp.dtype(out_dtype).itemsize))

    out = pl.pallas_call(
        kernel,
        out_shape=jax.ShapeDtypeStruct((T, N), out_dtype),
        grid_spec=pltpu.PrefetchScalarGridSpec(
            num_scalar_prefetch=0,
            grid=grid,
            in_specs=[
                pl.BlockSpec((tm, K), lambda i, j: (i, 0)),   # x tile (resident over j)
                pl.BlockSpec((K, tn), lambda i, j: (0, j)),   # weight column block
                pl.BlockSpec((1, tn), lambda i, j: (0, j)),   # per-column dequant scale
                pl.BlockSpec((1, tn), lambda i, j: (0, j)),   # bias segment
            ],
            out_specs=pl.BlockSpec((tm, tn), lambda i, j: (i, j)),
            scratch_shapes=[
                pltpu.VMEM((tm, K), xq_dtype),
                pltpu.VMEM((tm, 1), jnp.float32),
            ]),
        compiler_params=pltpu.CompilerParams(
            # j stays 'arbitrary': the cached quantized tile must see j==0
            # first for each i, so only the M axis is megacore-sharded.
            dimension_semantics=("parallel", "arbitrary"),
            vmem_limit_bytes=vmem_limit),
        cost_estimate=cost,
    )(x2, w_kn, col_scale, bias_vec)

    return out.reshape(*x_shape[:-1], N)


# ---------------------------------------------------------------------------
# Pure-JAX reference (mirrors the PyTorch forward; same documented deviations
# as the kernel: 1e-8 scale floor and x * (1/qs) instead of x / qs)
# ---------------------------------------------------------------------------
def _reference(x, weight_i8, qkv_size, q_scale, k_scale, v_scale, bias,
               act_quant):
    x_shape = x.shape
    dtype = x.dtype
    x2 = x.reshape(-1, x_shape[-1]).astype(jnp.float32)
    if act_quant == 'per-token':
        qs = jnp.max(jnp.abs(x2), axis=-1, keepdims=True) / 127.0
        qs = jnp.maximum(qs, 1e-8)
        xq = jnp.clip(jnp.round(x2 * (1.0 / qs)), -128, 127).astype(jnp.int8)
        qdq, kdq, vdq = q_scale * qs, k_scale * qs, v_scale * qs
    else:
        xq = jnp.clip(jnp.round(x2), -128, 127).astype(jnp.int8)
        qdq, kdq, vdq = q_scale, k_scale, v_scale
    out = jnp.dot(xq.astype(jnp.int32),
                  weight_i8.T.astype(jnp.int32)).astype(jnp.float32)
    s0, s1, _ = qkv_size
    q, k, v = out[:, :s0], out[:, s0:s0 + s1], out[:, s0 + s1:]
    q = qdq * q + (bias[:s0] if bias is not None else 0.0)
    k = kdq * k + (bias[s0:s0 + s1] if bias is not None else 0.0)
    v = vdq * v + (bias[s0 + s1:] if bias is not None else 0.0)
    out = jnp.concatenate([q, k, v], axis=-1)
    return out.reshape(*x_shape[:-1], -1).astype(dtype)


if __name__ == "__main__":
    key = jax.random.PRNGKey(0)
    k_x, k_w, k_b, k_x2 = jax.random.split(key, 4)

    in_features = 32
    qkv_size = (32, 32, 32)
    out_features = sum(qkv_size)

    # deterministic synthetic parameters (int8 weight, fp32 bias, scalar scales)
    weight_i8 = jax.random.randint(k_w, (out_features, in_features), -128, 128,
                                   dtype=jnp.int32).astype(jnp.int8)
    bias = jax.random.normal(k_b, (out_features,), dtype=jnp.float32)
    q_scale, k_scale, v_scale = 0.01, 0.02, 0.03

    # activations scaled up so per-tensor round/clamp is non-trivial
    cases = [
        (jax.random.normal(k_x, (2, 8, in_features), jnp.float32) * 20.0, bias),
        # ragged token count (exercises the masked tail block), no bias
        (jax.random.normal(k_x2, (12, in_features), jnp.float32) * 20.0, None),
    ]

    ok = True
    for x, b in cases:
        # one-time (load-time) prep: weight transpose + fused scale/bias rows
        w_kn, col_scale, bias_vec, has_bias = prepare_qkv_params(
            weight_i8, qkv_size, q_scale, k_scale, v_scale, bias=b)
        for act_quant in ('per-tensor', 'per-token'):
            out = w8a8_qkv_linear(x, w_kn, col_scale, bias_vec,
                                  has_bias=has_bias, act_quant=act_quant)
            out = jax.block_until_ready(out)
            ref = _reference(x, weight_i8, qkv_size, q_scale, k_scale, v_scale,
                             b, act_quant)
            if not jnp.allclose(out, ref, rtol=1e-5, atol=1e-5):
                ok = False

    if ok:
        print("KERNEL_OK")
</pallas_src>

<mosaic_0001>
module attributes {stable_mosaic.version = 11 : i64} {
  func.func @_qkv_int8_kernel(%arg0: i32, %arg1: i32, %arg2: memref<16x32xf32, #tpu.memory_space<vmem>>, %arg3: memref<32x96xi8, #tpu.memory_space<vmem>>, %arg4: memref<1x96xf32, #tpu.memory_space<vmem>>, %arg5: memref<1x96xf32, #tpu.memory_space<vmem>>, %arg6: memref<16x96xf32, #tpu.memory_space<vmem>>, %arg7: memref<16x32xi8, #tpu.memory_space<vmem>>, %arg8: memref<16x1xf32, #tpu.memory_space<vmem>>) attributes {dimension_semantics = [#tpu.dimension_semantics<parallel>, #tpu.dimension_semantics<arbitrary>], iteration_bounds = array<i64: 1, 1>, scalar_prefetch = 0 : i64, scratch_operands = 2 : i64, tpu.core_type = #tpu.core_type<tc>, window_params = [{transform_indices = @transform_0, window_bounds = array<i64: 16, 32>}, {transform_indices = @transform_1, window_bounds = array<i64: 32, 96>}, {transform_indices = @transform_2, window_bounds = array<i64: 1, 96>}, {transform_indices = @transform_3, window_bounds = array<i64: 1, 96>}, {transform_indices = @transform_4, window_bounds = array<i64: 16, 96>}]} {
    %c0_i32 = arith.constant 0 : i32
    %0 = arith.cmpi eq, %arg1, %c0_i32 : i32
    %1 = arith.extui %0 : i1 to i32
    %c0_i32_0 = arith.constant 0 : i32
    %2 = arith.cmpi ne, %1, %c0_i32_0 : i32
    scf.if %2 {
      %c0_10 = arith.constant 0 : index
      %c0_11 = arith.constant 0 : index
      %14 = vector.load %arg2[%c0_10, %c0_11] : memref<16x32xf32, #tpu.memory_space<vmem>>, vector<16x32xf32>
      %15 = math.roundeven %14 : vector<16x32xf32>
      %cst_12 = arith.constant -1.280000e+02 : f32
      %cst_13 = arith.constant 1.270000e+02 : f32
      %16 = vector.broadcast %cst_12 : f32 to vector<16x32xf32>
      %17 = arith.maximumf %16, %15 : vector<16x32xf32>
      %18 = vector.broadcast %cst_13 : f32 to vector<16x32xf32>
      %19 = arith.minimumf %18, %17 : vector<16x32xf32>
      %20 = arith.fptosi %19 : vector<16x32xf32> to vector<16x32xi8>
      %c0_14 = arith.constant 0 : index
      %c0_15 = arith.constant 0 : index
      %21 = vector.load %arg7[%c0_14, %c0_15] : memref<16x32xi8, #tpu.memory_space<vmem>>, vector<16x32xi8>
      tpu.vector_store %arg7[%c0_14, %c0_15], %20 {strides = array<i32>} : memref<16x32xi8, #tpu.memory_space<vmem>>, vector<16x32xi8>,
    } else {
    }
    %c0 = arith.constant 0 : index
    %c0_1 = arith.constant 0 : index
    %3 = vector.load %arg7[%c0, %c0_1] : memref<16x32xi8, #tpu.memory_space<vmem>>, vector<16x32xi8>
    %c0_2 = arith.constant 0 : index
    %c0_3 = arith.constant 0 : index
    %4 = vector.load %arg3[%c0_2, %c0_3] : memref<32x96xi8, #tpu.memory_space<vmem>>, vector<32x96xi8>
    %cst = arith.constant dense<0> : vector<16x96xi32>
    %5 = tpu.matmul %3, %4, %cst {dimension_numbers = #tpu.dot_dimension_numbers<[1], [0], [0], [1], [0, 0, 1, 1], [], []>} : vector<16x32xi8>, vector<32x96xi8>, vector<16x96xi32> -> vector<16x96xi32>
    %6 = arith.sitofp %5 : vector<16x96xi32> to vector<16x96xf32>
    %c0_4 = arith.constant 0 : index
    %c0_5 = arith.constant 0 : index
    %7 = vector.load %arg4[%c0_4, %c0_5] : memref<1x96xf32, #tpu.memory_space<vmem>>, vector<1x96xf32>
    %8 = vector.broadcast %7 : vector<1x96xf32> to vector<16x96xf32>
    %9 = arith.mulf %8, %6 : vector<16x96xf32>
    %c0_6 = arith.constant 0 : index
    %c0_7 = arith.constant 0 : index
    %10 = vector.load %arg5[%c0_6, %c0_7] : memref<1x96xf32, #tpu.memory_space<vmem>>, vector<1x96xf32>
    %11 = vector.broadcast %10 : vector<1x96xf32> to vector<16x96xf32>
    %12 = arith.addf %9, %11 : vector<16x96xf32>
    %c0_8 = arith.constant 0 : index
    %c0_9 = arith.constant 0 : index
    %13 = vector.load %arg6[%c0_8, %c0_9] : memref<16x96xf32, #tpu.memory_space<vmem>>, vector<16x96xf32>
    tpu.vector_store %arg6[%c0_8, %c0_9], %12 {strides = array<i32>} : memref<16x96xf32, #tpu.memory_space<vmem>>, vector<16x96xf32>,
    return
  }
  func.func @transform_0(%arg0: i32, %arg1: i32) -> (i32, i32) {
    %c0_i32 = arith.constant 0 : i32
    %c0_i32_0 = arith.constant 0 : i32
    return %arg0, %c0_i32 : i32, i32
  }
  func.func @transform_1(%arg0: i32, %arg1: i32) -> (i32, i32) {
    %c0_i32 = arith.constant 0 : i32
    %c0_i32_0 = arith.constant 0 : i32
    return %c0_i32, %arg1 : i32, i32
  }
  func.func @transform_2(%arg0: i32, %arg1: i32) -> (i32, i32) {
    %c0_i32 = arith.constant 0 : i32
    %c0_i32_0 = arith.constant 0 : i32
    return %c0_i32, %arg1 : i32, i32
  }
  func.func @transform_3(%arg0: i32, %arg1: i32) -> (i32, i32) {
    %c0_i32 = arith.constant 0 : i32
    %c0_i32_0 = arith.constant 0 : i32
    return %c0_i32, %arg1 : i32, i32
  }
  func.func @transform_4(%arg0: i32, %arg1: i32) -> (i32, i32) {
    %c0_i32 = arith.constant 0 : i32
    return %arg0, %arg1 : i32, i32
  }
}

</mosaic_0001>

<bundles_post_ra>
// kernel: tpu_custom_call.1
= control target key start
LH: loop header
LB: loop body
LE: loop exit
PB: predicated region body
PF: predicated region fallthrough
CT: control target
= control target key end

     0   :  { %9 = vsyncpa [#allocation5], 0  ;;  %s291_s0 = inlined_call_operand.hbm [shape: f32[16,32], index: 0, kind: input, shape index: {}]   ;;  %s292_s1 = inlined_call_operand.hbm [shape: s8[32,96], index: 1, kind: input, shape index: {}]   ;;  %s293_s2 = inlined_call_operand.vmem [shape: f32[1,96], index: 2, kind: input, shape index: {}]   ;;  %s294_s3 = inlined_call_operand.vmem [shape: f32[1,96], index: 3, kind: input, shape index: {}]   ;;  %s295_s4 = inlined_call_operand.hbm [shape: f32[16,96], index: 4, kind: output, shape index: {}]  }
   0x1   :  { %10 = vsyncpa [#allocation8], 0 }
   0x2   :  { %11 = vsyncpa [#allocation6], 0  ;;  %s16_s17 = sshll.u32 %s291_s0, 4  ;;  %s240_s18 = smov [#allocation4]   ;;  %s17_s17 = int_to_ptr.hbm [resolvable:$true] %s16_s17 }
   0x3   :  { %s18_s19 = sshll.u32 %s240_s18, 4  ;;  %s30_s22 = sshll.u32 %s292_s1, 4  ;;  %s19_s19 = int_to_ptr.vmem [resolvable:$true] %s18_s19  ;;  %s31_s22 = int_to_ptr.hbm [resolvable:$true] %s30_s22 }
   0x4   :  { %s241_s23 = smov 128   ;;  %s242_s24 = smov 8  }
   0x5   :  { %24 = dma.hbm_to_vmem [thread:$0]  %s17_s17, 256, %s19_s19, [#allocation5], %s241_s23, %s241_s23, %s242_s24  }
   0x6   :  { %s243_s25 = smov [#allocation7]  }
   0x7   :  { %s32_s26 = sshll.u32 %s243_s25, 4  ;;  %s33_s26 = int_to_ptr.vmem [resolvable:$true] %s32_s26 }
   0x8   :  { %35 = dma.hbm_to_vmem [thread:$0]  %s31_s22, 128, %s33_s26, [#allocation8]  }
   0x9   :  { %234 = dma.done.wait [#allocation5], 256  }
   0xa   :  { %235 = vsyncadd [#allocation5], 4294967040 }
   0xb   :  { %236 = dma.done.wait [#allocation8], 128  }
   0xc   :  { %237 = vsyncadd [#allocation8], 4294967168  ;;  %v53_v0 = vld [vmem:[#allocation4] sm:$0xff]  ;;  %v54_v1 = vld [vmem:[#allocation4 + $0x8] sm:$0xff]  ;;  %vm71_vm0 = vcmask 254976   ;;  %vm81_vm1 = vcmask 261120  }
   0xd   :  { %v76_v2 = vld [vmem:[#allocation7] sm:$0xff]  ;;  %v138_v3 = vmax.f32 %v53_v0, -128.0  ;;  %v141_v4 = vmax.f32 %v54_v1, -128.0  ;;  %v160_v18 = vld [vmem:[%s293_s2] ss:$0 sm:$0xff]  ;;  %vm111_vm2 = vcmask 785408  }
   0xe   :  { %88 = vmatpush.s8.msra.mxu0 %v76_v2  ;;  %v161_v21 = vld [vmem:[%s294_s3] ss:$0 sm:$0xff]  ;;  %s244_s29 = smov [#allocation9]   ;;  %s120_s7 = sshll.u32 %s295_s4, 4  ;;  %s121_s7 = int_to_ptr.hbm [resolvable:$true] %s120_s7 }
   0xf   :  { %v139_v5 = vmin.f32 %v138_v3, 127.0  ;;  %v142_v6 = vmin.f32 %v141_v4, 127.0  ;;  %s118_s30 = sshll.u32 %s244_s29, 4  ;;  %s119_s30 = int_to_ptr.vmem [resolvable:$true] %s118_s30 }
  0x11   :  { %v151_v7 = vcvt.f32.s32 %v139_v5  ;;  %v154_v8 = vcvt.f32.s32 %v142_v6 }
  0x13   :  { %v67_v9 = vpack.c.b16 %v151_v7, %v151_v7  ;;  %v69_v10 = vpack.c.b16 %v154_v8, %v154_v8 }
  0x15   :  { %v68_v11 = vpack.c.b8 %v67_v9, %v67_v9  ;;  %v70_v12 = vpack.c.b8 %v69_v10, %v69_v10 }
  0x17   :  { %72 = vst.msk [vmem:[#allocation2] sm:$0x3] %vm71_vm0, %v68_v11 }
  0x18   :  { %73 = vst.msk [vmem:[#allocation2 + $0x2] sm:$0x3] %vm71_vm0, %v70_v12 }
  0x1f   :  { %v146_v13 = vld [vmem:[#allocation2] sm:$0xf]  }
  0x20   :  { %v147_v14 = vunpack.c.0.s8 %v146_v13  ;;  %v148_v15 = vunpack.c.1.s8 %v146_v13 }
  0x22   :  { %v79_v16 = vpack.c.b16 %v148_v15, %v147_v14 }
  0x24   :  { %v80_v17 = vpack.c.b8 %v79_v16, %v79_v16 }
  0x26   :  { %144 = vmatmul.msk.s8.vlgmr.msra.gmra.mxu0 %vm81_vm1, %v80_v17 }
  0x99   :  { %v90_v19 = vpop.s32.mrf.mxu0 }
  0x9a   :  { %v97_v20 = vcvt.s32.f32 %v90_v19 }
  0x9c   :  { %v103_v22 = vmul.f32 %v160_v18, %v97_v20 }
  0x9d   :  { %v92_v23 = vpop.s32.mrf.mxu0 }
  0x9e   :  { %v109_v24 = vadd.f32 %v161_v21, %v103_v22  ;;  %v98_v25 = vcvt.s32.f32 %v92_v23 }
  0xa0   :  { %v104_v26 = vmul.f32 %v160_v18, %v98_v25  ;;  %112 = vst.msk [vmem:[#allocation9] sm:$0xff] %vm111_vm2, %v109_v24 }
  0xa1   :  { %v94_v27 = vpop.s32.mrf.mxu0 }
  0xa2   :  { %v110_v28 = vadd.f32 %v161_v21, %v104_v26 }
  0xa4   :  { %113 = vst.msk [vmem:[#allocation9 + $0x8] sm:$0xff] %vm111_vm2, %v110_v28 }
  0xa5   :  { %v95_v29 = vpop.s32.mrf.mxu0  ;;  %126 = dma.vmem_to_hbm [thread:$0]  %s119_s30, 256, %s121_s7, [#allocation6], %s241_s23, %s241_s23, %s242_s24  }
  0xa6   :  { %238 = dma.done.wait [#allocation6], 256  }
  0xa7   :  { %239 = vsyncadd [#allocation6], 4294967040 }
  0xa8   :  { %131 = vsyncpa [#allocation5], 1 }
  0xa9   :  { %132 = vsyncpa [#allocation8], 1 }
  0xaa   :  { %133 = vsyncpa [#allocation6], 1 }

</bundles_post_ra>
